<compile_context>
chip_gen: v6e
topology: v6e:2x2x1
jax: 0.10.0
libtpu: 0.0.40
codegen_flags: <defaults>
</compile_context>

<pallas_src>
import jax
import jax.numpy as jnp
from jax.experimental import pallas as pl
from jax.experimental.pallas import tpu as pltpu


# ---------------------------------------------------------------------------
# Phase 1:  y = D^{-1/2} (X @ W)      (computed once, not per row tile)
# ---------------------------------------------------------------------------
def linear_kernel(x_ref, w_ref, dinv_ref, y_ref):
    xw = jnp.dot(x_ref[...], w_ref[...], preferred_element_type=jnp.float32)
    y_ref[...] = (dinv_ref[...] * xw).astype(y_ref.dtype)


# ---------------------------------------------------------------------------
# Phase 2:  propagation + bias + log_softmax, K-tiled with f32 accumulator
# ---------------------------------------------------------------------------
def prop_kernel(adj_ref, y_ref, yrow_ref, dinv_ref, b_ref, out_ref, acc_ref):
    k = pl.program_id(1)

    @pl.when(k == 0)
    def _():
        acc_ref[...] = jnp.zeros_like(acc_ref)

    # [tm, tk] @ [tk, F] on the MXU (bf16 operands, f32 accumulation).
    acc_ref[...] += jnp.dot(adj_ref[...], y_ref[...],
                            preferred_element_type=jnp.float32)

    @pl.when(k == pl.num_programs(1) - 1)
    def _():
        dinv_rows = dinv_ref[...]                                  # [tm, 1] f32
        # Self-loop folded algebraically: (A + I) y  ->  A y + y_rows.
        out = dinv_rows * (acc_ref[...] + yrow_ref[...].astype(jnp.float32))
        out = out + b_ref[...]                                     # [tm, F]

        # log_softmax over the feature dim (dim=1).
        m = jnp.max(out, axis=1, keepdims=True)
        shifted = out - m
        lse = jnp.log(jnp.sum(jnp.exp(shifted), axis=1, keepdims=True))
        z = shifted - lse

        # Lane-dense packed writeback: [tm, 2*F] (out in [0,F), z in [F,2F)).
        out_ref[...] = jnp.concatenate([out, z], axis=-1)


def gcn_forward(x, adj, w, b, *, prop_dtype=jnp.bfloat16, tm=None, tk=None):
    """x: [N,F_in] f32, adj: [N,N] 0/1 f32 (zero diagonal), w: [F_in,F_out], b: [F_out]."""
    N, f_in = x.shape
    f_out = w.shape[1]

    # Tile sizes: single step at small N, capped for large N.
    # (v7x note: for large N pick tm so that N // tm is even -> both TCs busy.)
    if tm is None:
        tm = N if N <= 256 else 256
    if tk is None:
        tk = N if N <= 512 else 512
    assert N % tm == 0 and N % tk == 0 and tm % 8 == 0
    assert tk == N or tk % 128 == 0

    # deg(A + I) = rowsum(A) + 1  (>= 1, no clamp needed).
    deg = jnp.sum(adj, axis=1, keepdims=True) + 1.0
    dinv = jax.lax.rsqrt(deg).astype(jnp.float32)                  # [N, 1]

    # ---- phase 1: y = dinv * (X @ W), emitted in the propagation dtype ----
    tn = N if N <= 256 else 256
    assert N % tn == 0
    y = pl.pallas_call(
        linear_kernel,
        out_shape=jax.ShapeDtypeStruct((N, f_out), prop_dtype),
        grid_spec=pltpu.PrefetchScalarGridSpec(
            num_scalar_prefetch=0,
            grid=(N // tn,),
            in_specs=[
                pl.BlockSpec((tn, f_in), lambda i: (i, 0)),        # X rows
                pl.BlockSpec((f_in, f_out), lambda i: (0, 0)),     # W (resident)
                pl.BlockSpec((tn, 1), lambda i: (i, 0)),           # dinv rows
            ],
            out_specs=pl.BlockSpec((tn, f_out), lambda i: (i, 0)),
        ),
        compiler_params=pltpu.CompilerParams(
            dimension_semantics=("parallel",)),
    )(x.astype(jnp.float32), w.astype(jnp.float32), dinv)

    # ---- phase 2: propagation + log_softmax ----
    adj_p = adj.astype(prop_dtype)                                 # 0/1 exact in bf16
    b2 = b.reshape(1, f_out).astype(jnp.float32)

    n_row = N // tm
    n_k = N // tk
    itemsize = jnp.dtype(prop_dtype).itemsize

    flops = int(2 * N * N * f_out + 4 * N * f_out)                 # A@y + epilogue
    transcendentals = int(N * f_out + N)                           # exp + log
    bytes_accessed = int(itemsize * (N * N + N * f_out * (n_k + n_row))
                         + 4 * (N + f_out + N * 2 * f_out))

    # Explicit VMEM budget only once it exceeds the scoped default.
    need = (2 * tm * tk * itemsize        # double-buffered adjacency block
            + 2 * tk * f_out * itemsize   # double-buffered y K-block
            + tm * f_out * itemsize       # y row block (self loop)
            + tm * f_out * 4              # f32 accumulator scratch
            + 2 * tm * 2 * f_out * 4)     # packed output block (double-buffered)
    vmem_limit = None
    if need > 16 * 1024 * 1024:
        vmem_limit = min(int(need * 2), 48 * 1024 * 1024)          # stay under v7x 64 MiB

    packed = pl.pallas_call(
        prop_kernel,
        out_shape=jax.ShapeDtypeStruct((N, 2 * f_out), jnp.float32),
        grid_spec=pltpu.PrefetchScalarGridSpec(
            num_scalar_prefetch=0,
            grid=(n_row, n_k),
            in_specs=[
                pl.BlockSpec((tm, tk), lambda i, k: (i, k)),       # adjacency block
                pl.BlockSpec((tk, f_out), lambda i, k: (k, 0)),    # y K-block
                pl.BlockSpec((tm, f_out), lambda i, k: (i, 0)),    # y rows (self loop)
                pl.BlockSpec((tm, 1), lambda i, k: (i, 0)),        # dinv rows
                pl.BlockSpec((1, f_out), lambda i, k: (0, 0)),     # bias
            ],
            out_specs=pl.BlockSpec((tm, 2 * f_out), lambda i, k: (i, 0)),
            scratch_shapes=[pltpu.VMEM((tm, f_out), jnp.float32)],
        ),
        compiler_params=pltpu.CompilerParams(
            dimension_semantics=("parallel", "arbitrary"),
            vmem_limit_bytes=vmem_limit),
        cost_estimate=pl.CostEstimate(
            flops=flops, transcendentals=transcendentals,
            bytes_accessed=bytes_accessed),
    )(adj_p, y, y, dinv, b2)

    out = packed[:, :f_out]
    z = packed[:, f_out:]
    return out, z


def reference_forward(x, adj, w, b):
    N = x.shape[0]
    a = adj + jnp.eye(N, dtype=adj.dtype)
    deg = jnp.sum(a, axis=1, keepdims=True)
    dinv = 1.0 / jnp.sqrt(deg)
    a_norm = a * dinv * dinv.T
    out = a_norm @ (x @ w) + b[None, :]
    z = jax.nn.log_softmax(out, axis=1)
    return out, z


if __name__ == "__main__":
    key = jax.random.PRNGKey(0)
    k_x, k_adj, k_w = jax.random.split(key, 3)

    N, F_IN, F_OUT = 128, 64, 64

    # node features
    x = jax.random.normal(k_x, (N, F_IN), dtype=jnp.float32)

    # random symmetric 0/1 adjacency (~5% density), no self loops
    upper = (jax.random.uniform(k_adj, (N, N)) < 0.05).astype(jnp.float32)
    adj = jnp.triu(upper, k=1)
    adj = adj + adj.T

    # GCNConv parameters: glorot-uniform weight, zero bias (deterministic)
    limit = jnp.sqrt(6.0 / (F_IN + F_OUT))
    w = jax.random.uniform(k_w, (F_IN, F_OUT), dtype=jnp.float32,
                           minval=-limit, maxval=limit)
    b = jnp.zeros((F_OUT,), dtype=jnp.float32)

    out_ref, z_ref = reference_forward(x, adj, w, b)

    # Fast path: bf16 propagation operands (f32 accumulation) -> relaxed check.
    out_bf, z_bf = gcn_forward(x, adj, w, b, prop_dtype=jnp.bfloat16)
    jax.block_until_ready((out_bf, z_bf))
    assert jnp.allclose(out_bf, out_ref, atol=7.5e-2, rtol=7.5e-2)
    assert jnp.allclose(z_bf, z_ref, atol=7.5e-2, rtol=7.5e-2)

    # f32 validation path -> tight check against the pure-JAX reference.
    out_f32, z_f32 = gcn_forward(x, adj, w, b, prop_dtype=jnp.float32)
    jax.block_until_ready((out_f32, z_f32))
    assert jnp.allclose(out_f32, out_ref, atol=1e-4, rtol=1e-4)
    assert jnp.allclose(z_f32, z_ref, atol=1e-4, rtol=1e-4)

    print("KERNEL_OK")
</pallas_src>

<mosaic_0001>
module attributes {stable_mosaic.version = 11 : i64} {
  func.func @linear_kernel(%arg0: i32, %arg1: memref<128x64xf32, #tpu.memory_space<vmem>>, %arg2: memref<64x64xf32, #tpu.memory_space<vmem>>, %arg3: memref<128x1xf32, #tpu.memory_space<vmem>>, %arg4: memref<128x64xbf16, #tpu.memory_space<vmem>>) attributes {dimension_semantics = [#tpu.dimension_semantics<parallel>], iteration_bounds = array<i64: 1>, scalar_prefetch = 0 : i64, scratch_operands = 0 : i64, tpu.core_type = #tpu.core_type<tc>, window_params = [{transform_indices = @transform_0, window_bounds = array<i64: 128, 64>}, {pipeline_mode = #tpu.pipeline_mode<synchronous>, transform_indices = @transform_1, window_bounds = array<i64: 64, 64>}, {transform_indices = @transform_2, window_bounds = array<i64: 128, 1>}, {transform_indices = @transform_3, window_bounds = array<i64: 128, 64>}]} {
    %c0 = arith.constant 0 : index
    %c0_0 = arith.constant 0 : index
    %0 = vector.load %arg1[%c0, %c0_0] : memref<128x64xf32, #tpu.memory_space<vmem>>, vector<128x64xf32>
    %c0_1 = arith.constant 0 : index
    %c0_2 = arith.constant 0 : index
    %1 = vector.load %arg2[%c0_1, %c0_2] : memref<64x64xf32, #tpu.memory_space<vmem>>, vector<64x64xf32>
    %cst = arith.constant dense<0.000000e+00> : vector<128x64xf32>
    %2 = tpu.matmul %0, %1, %cst {dimension_numbers = #tpu.dot_dimension_numbers<[1], [0], [0], [1], [0, 0, 1, 1], [], []>} : vector<128x64xf32>, vector<64x64xf32>, vector<128x64xf32> -> vector<128x64xf32>
    %c0_3 = arith.constant 0 : index
    %c0_4 = arith.constant 0 : index
    %3 = vector.load %arg3[%c0_3, %c0_4] : memref<128x1xf32, #tpu.memory_space<vmem>>, vector<128x1xf32>
    %4 = vector.broadcast %3 : vector<128x1xf32> to vector<128x64xf32>
    %5 = arith.mulf %4, %2 : vector<128x64xf32>
    %6 = arith.truncf %5 : vector<128x64xf32> to vector<128x64xbf16>
    %c0_5 = arith.constant 0 : index
    %c0_6 = arith.constant 0 : index
    %7 = vector.load %arg4[%c0_5, %c0_6] : memref<128x64xbf16, #tpu.memory_space<vmem>>, vector<128x64xbf16>
    tpu.vector_store %arg4[%c0_5, %c0_6], %6 {strides = array<i32>} : memref<128x64xbf16, #tpu.memory_space<vmem>>, vector<128x64xbf16>,
    return
  }
  func.func @transform_0(%arg0: i32) -> (i32, i32) {
    %c0_i32 = arith.constant 0 : i32
    %c0_i32_0 = arith.constant 0 : i32
    return %arg0, %c0_i32 : i32, i32
  }
  func.func @transform_1(%arg0: i32) -> (i32, i32) {
    %c0_i32 = arith.constant 0 : i32
    %c0_i32_0 = arith.constant 0 : i32
    %c0_i32_1 = arith.constant 0 : i32
    return %c0_i32, %c0_i32_0 : i32, i32
  }
  func.func @transform_2(%arg0: i32) -> (i32, i32) {
    %c0_i32 = arith.constant 0 : i32
    %c0_i32_0 = arith.constant 0 : i32
    return %arg0, %c0_i32 : i32, i32
  }
  func.func @transform_3(%arg0: i32) -> (i32, i32) {
    %c0_i32 = arith.constant 0 : i32
    %c0_i32_0 = arith.constant 0 : i32
    return %arg0, %c0_i32 : i32, i32
  }
}

</mosaic_0001>

<bundles_post_ra>
// kernel: tpu_custom_call.1
= control target key start
LH: loop header
LB: loop body
LE: loop exit
PB: predicated region body
PF: predicated region fallthrough
CT: control target
= control target key end

     0   :  { %v560_v2 = vmov 0   ;;  %vm38_vm0 = vcmask 523264   ;;  %vm408_vm1 = vcmask 519168   ;;  %s784_s1 = inlined_call_operand.vmem [shape: f32[64,64], index: 1, kind: input, shape index: {}]   ;;  %s785_s0 = inlined_call_operand.vmem [shape: f32[128,64], index: 0, kind: input, shape index: {}]   ;;  %s786_s2 = inlined_call_operand.vmem [shape: f32[128,1], index: 2, kind: input, shape index: {}]   ;;  %s787_s3 = inlined_call_operand.vmem [shape: bf16[128,64], index: 3, kind: output, shape index: {}]  }
   0x1   :  { %v37_v0 = vld [vmem:[%s784_s1 + $0x38] sm:$0xff]  ;;  %v36_v1 = vld [vmem:[%s784_s1 + $0x30] sm:$0xff]  ;;  %559 = vset.pattern.permute.xlu1 %v560_v2  ;;  %558 = vset.pattern.permute.xlu0 %v560_v2  ;;  %v35_v3 = vld [vmem:[%s784_s1 + $0x28] sm:$0xff] }
   0x2   :  { %501 = vmatprep.subr.mxu0 %v37_v0  ;;  %541 = vmatprep.subr.mxu1 %v37_v0  ;;  %v34_v4 = vld [vmem:[%s784_s1 + $0x20] sm:$0xff]  ;;  %v33_v5 = vld [vmem:[%s784_s1 + $0x18] sm:$0xff]  ;;  %v32_v6 = vld [vmem:[%s784_s1 + $0x10] sm:$0xff] }
   0x3   :  { %502 = vmatpush3.msra.mxu0 %v37_v0  ;;  %549 = vmatpush3.msra.mxu1 %v37_v0  ;;  %v31_v7 = vld [vmem:[%s784_s1 + $0x8] sm:$0xff]  ;;  %v30_v8 = vld [vmem:[%s784_s1] sm:$0xff]  ;;  %v16_v13 = vld [vmem:[%s785_s0 + $0x10] sm:$0xff] }
   0x4   :  { %503 = vmatprep.subr.mxu0 %v36_v1  ;;  %542 = vmatprep.subr.mxu1 %v36_v1  ;;  %v14_v9 = vld [vmem:[%s785_s0] sm:$0xff]  ;;  %v15_v11 = vld [vmem:[%s785_s0 + $0x8] sm:$0xff]  ;;  %v24_v14 = vld [vmem:[%s785_s0 + $0x50] sm:$0xff] }
   0x5   :  { %504 = vmatpush3.msra.mxu0 %v36_v1  ;;  %550 = vmatpush3.msra.mxu1 %v36_v1  ;;  %v22_v10 = vld [vmem:[%s785_s0 + $0x40] sm:$0xff]  ;;  %v23_v12 = vld [vmem:[%s785_s0 + $0x48] sm:$0xff]  ;;  %v234_v15 = vld [vmem:[%s786_s2 + $0x10] sm:$0xff] }
   0x6   :  { %505 = vmatprep.subr.mxu0 %v35_v3  ;;  %543 = vmatprep.subr.mxu1 %v35_v3  ;;  %v232_v16 = vld [vmem:[%s786_s2] sm:$0xff]  ;;  %v17_v17 = vld [vmem:[%s785_s0 + $0x18] sm:$0xff]  ;;  %v233_v22 = vld [vmem:[%s786_s2 + $0x8] sm:$0xff] }
   0x7   :  { %506 = vmatpush3.msra.mxu0 %v35_v3  ;;  %551 = vmatpush3.msra.mxu1 %v35_v3  ;;  %v25_v18 = vld [vmem:[%s785_s0 + $0x58] sm:$0xff]  ;;  %v18_v19 = vld [vmem:[%s785_s0 + $0x20] sm:$0xff]  ;;  %v19_v23 = vld [vmem:[%s785_s0 + $0x28] sm:$0xff] }
   0x8   :  { %507 = vmatprep.subr.mxu0 %v34_v4  ;;  %544 = vmatprep.subr.mxu1 %v34_v4  ;;  %v26_v20 = vld [vmem:[%s785_s0 + $0x60] sm:$0xff]  ;;  %v235_v21 = vld [vmem:[%s786_s2 + $0x18] sm:$0xff]  ;;  %v27_v24 = vld [vmem:[%s785_s0 + $0x68] sm:$0xff] }
   0x9   :  { %508 = vmatpush3.msra.mxu0 %v34_v4  ;;  %552 = vmatpush3.msra.mxu1 %v34_v4  ;;  %v20_v25 = vld [vmem:[%s785_s0 + $0x30] sm:$0xff]  ;;  %v237_v27 = vld [vmem:[%s786_s2 + $0x28] sm:$0xff]  ;;  %v236_v28 = vld [vmem:[%s786_s2 + $0x20] sm:$0xff] }
   0xa   :  { %509 = vmatprep.subr.mxu0 %v33_v5  ;;  %545 = vmatprep.subr.mxu1 %v33_v5  ;;  %v28_v26 = vld [vmem:[%s785_s0 + $0x70] sm:$0xff]  ;;  %v21_v29 = vld [vmem:[%s785_s0 + $0x38] sm:$0xff]  ;;  %v241_v33 = vld [vmem:[%s786_s2 + $0x48] sm:$0xff] }
   0xb   :  { %510 = vmatpush3.msra.mxu0 %v33_v5  ;;  %553 = vmatpush3.msra.mxu1 %v33_v5  ;;  %v29_v30 = vld [vmem:[%s785_s0 + $0x78] sm:$0xff]  ;;  %v238_v32 = vld [vmem:[%s786_s2 + $0x30] sm:$0xff]  ;;  %v240_v34 = vld [vmem:[%s786_s2 + $0x40] sm:$0xff] }
   0xc   :  { %511 = vmatprep.subr.mxu0 %v32_v6  ;;  %546 = vmatprep.subr.mxu1 %v32_v6  ;;  %v239_v31 = vld [vmem:[%s786_s2 + $0x38] sm:$0xff]  ;;  %v242_v36 = vld [vmem:[%s786_s2 + $0x50] sm:$0xff]  ;;  %v245_v37 = vld [vmem:[%s786_s2 + $0x68] sm:$0xff] }
   0xd   :  { %512 = vmatpush3.msra.mxu0 %v32_v6  ;;  %554 = vmatpush3.msra.mxu1 %v32_v6  ;;  %v243_v35 = vld [vmem:[%s786_s2 + $0x58] sm:$0xff]  ;;  %v244_v38 = vld [vmem:[%s786_s2 + $0x60] sm:$0xff]  ;;  %v246_v40 = vld [vmem:[%s786_s2 + $0x70] sm:$0xff] }
   0xe   :  { %513 = vmatprep.subr.mxu0 %v31_v7  ;;  %547 = vmatprep.subr.mxu1 %v31_v7  ;;  %v247_v39 = vld [vmem:[%s786_s2 + $0x78] sm:$0xff] }
   0xf   :  { %514 = vmatpush3.msra.mxu0 %v31_v7  ;;  %555 = vmatpush3.msra.mxu1 %v31_v7 }
  0x10   :  { %515 = vmatprep.subr.mxu0 %v30_v8  ;;  %548 = vmatprep.subr.mxu1 %v30_v8 }
  0x11   :  { %516 = vmatpush3.msra.mxu0 %v30_v8  ;;  %556 = vmatpush3.msra.mxu1 %v30_v8 }
  0x12   :  { %517 = vmatprep.mubr.msk.f32.mxu0 %vm38_vm0, %v14_v9  ;;  %529 = vmatprep.mubr.msk.f32.mxu1 %vm38_vm0, %v22_v10 }
  0x13   :  { %518 = vmatmul.mubr.msk.f32.vlgmr.msra.gmra.mxu0 %vm38_vm0, %v15_v11  ;;  %530 = vmatmul.mubr.msk.f32.vlgmr.msra.gmra.mxu1 %vm38_vm0, %v23_v12 }
  0x14   :  { %520 = vmatprep.mubr.msk.f32.mxu0 %vm38_vm0, %v16_v13  ;;  %532 = vmatprep.mubr.msk.f32.mxu1 %vm38_vm0, %v24_v14 }
  0x15   :  { %260 = vperm.xlu1 %559, %v234_v15   ;;  %250 = vperm.xlu0 %558, %v232_v16  }
  0x17   :  { %521 = vmatmul.mubr.msk.f32.gmra.mxu0 %vm38_vm0, %v17_v17  ;;  %533 = vmatmul.mubr.msk.f32.gmra.mxu1 %vm38_vm0, %v25_v18 }
  0x18   :  { %523 = vmatprep.mubr.msk.f32.mxu0 %vm38_vm0, %v18_v19  ;;  %535 = vmatprep.mubr.msk.f32.mxu1 %vm38_vm0, %v26_v20 }
  0x19   :  { %265 = vperm.xlu1 %559, %v235_v21   ;;  %255 = vperm.xlu0 %558, %v233_v22  }
  0x1b   :  { %524 = vmatmul.mubr.msk.f32.gmra.mxu0 %vm38_vm0, %v19_v23  ;;  %536 = vmatmul.mubr.msk.f32.gmra.mxu1 %vm38_vm0, %v27_v24 }
  0x1c   :  { %526 = vmatprep.mubr.msk.f32.mxu0 %vm38_vm0, %v20_v25  ;;  %538 = vmatprep.mubr.msk.f32.mxu1 %vm38_vm0, %v28_v26 }
  0x1d   :  { %275 = vperm.xlu1 %559, %v237_v27   ;;  %270 = vperm.xlu0 %558, %v236_v28  }
  0x1f   :  { %527 = vmatmul.mubr.msk.f32.gmra.mxu0 %vm38_vm0, %v21_v29  ;;  %539 = vmatmul.mubr.msk.f32.gmra.mxu1 %vm38_vm0, %v29_v30 }
  0x21   :  { %285 = vperm.xlu1 %559, %v239_v31   ;;  %280 = vperm.xlu0 %558, %v238_v32  }
  0x25   :  { %295 = vperm.xlu1 %559, %v241_v33   ;;  %290 = vperm.xlu0 %558, %v240_v34  }
  0x29   :  { %305 = vperm.xlu1 %559, %v243_v35   ;;  %300 = vperm.xlu0 %558, %v242_v36  }
  0x2d   :  { %315 = vperm.xlu1 %559, %v245_v37   ;;  %310 = vperm.xlu0 %558, %v244_v38  }
  0x31   :  { %325 = vperm.xlu1 %559, %v247_v39   ;;  %320 = vperm.xlu0 %558, %v246_v40  }
  0x90   :  { %v261_v41 = vpop.permute.xlu1 %260  ;;  %v251_v42 = vpop.permute.xlu0 %250 }
  0x94   :  { %v266_v43 = vpop.permute.xlu1 %265  ;;  %v256_v44 = vpop.permute.xlu0 %255 }
  0x98   :  { %v276_v45 = vpop.permute.xlu1 %275  ;;  %v271_v46 = vpop.permute.xlu0 %270 }
  0x9c   :  { %v286_v47 = vpop.permute.xlu1 %285  ;;  %v717_v48 = vpop.permute.xlu0 %280 }
  0xa0   :  { %v296_v49 = vpop.permute.xlu1 %295  ;;  %v291_v50 = vpop.permute.xlu0 %290 }
  0xa4   :  { %v306_v51 = vpop.permute.xlu1 %305  ;;  %v301_v54 = vpop.permute.xlu0 %300 }
  0xa8   :  { %v316_v1 = vpop.permute.xlu1 %315  ;;  %v311_v8 = vpop.permute.xlu0 %310 }
  0xac   :  { %v326_v21 = vpop.permute.xlu1 %325  ;;  %v321_v28 = vpop.permute.xlu0 %320 }
  0xd3   :  { %v519_v52 = vpop.f32.mrf.mxu0  ;;  %v531_v53 = vpop.f32.mrf.mxu1 }
  0xd4   :  { %v329_v55 = vmul.f32 %v519_v52, %v256_v44  ;;  %v337_v56 = vmul.f32 %v531_v53, %v296_v49 }
  0xd5   :  { %v153_v57 = vpop.f32.mrf.mxu0  ;;  %v193_v58 = vpop.f32.mrf.mxu1 }
  0xd6   :  { %v462_v59 = vpack.c.bf16 %v329_v55, %v329_v55  ;;  %v470_v60 = vpack.c.bf16 %v337_v56, %v337_v56  ;;  %v328_v61 = vmul.f32 %v251_v42, %v153_v57  ;;  %v336_v62 = vmul.f32 %v291_v50, %v193_v58 }
  0xd7   :  { %v522_v63 = vpop.f32.mrf.mxu0  ;;  %v534_v0 = vpop.f32.mrf.mxu1 }
  0xd8   :  { %410 = vst.msk [vmem:[%s787_s3 + $0x4] sm:$0xf] %vm408_vm1, %v462_v59  ;;  %418 = vst.msk [vmem:[%s787_s3 + $0x24] sm:$0xf] %vm408_vm1, %v470_v60  ;;  %v461_v2 = vpack.c.bf16 %v328_v61, %v328_v61  ;;  %v469_v3 = vpack.c.bf16 %v336_v62, %v336_v62  ;;  %v331_v4 = vmul.f32 %v522_v63, %v266_v43 }
  0xd9   :  { %v339_v5 = vmul.f32 %v534_v0, %v306_v51  ;;  %v163_v6 = vpop.f32.mrf.mxu0  ;;  %v203_v7 = vpop.f32.mrf.mxu1 }
  0xda   :  { %409 = vst.msk [vmem:[%s787_s3] sm:$0xf] %vm408_vm1, %v461_v2  ;;  %417 = vst.msk [vmem:[%s787_s3 + $0x20] sm:$0xf] %vm408_vm1, %v469_v3  ;;  %v464_v9 = vpack.c.bf16 %v331_v4, %v331_v4  ;;  %v330_v11 = vmul.f32 %v261_v41, %v163_v6  ;;  %v338_v12 = vmul.f32 %v301_v54, %v203_v7 }
  0xdb   :  { %v472_v10 = vpack.c.bf16 %v339_v5, %v339_v5  ;;  %v525_v13 = vpop.f32.mrf.mxu0  ;;  %v537_v14 = vpop.f32.mrf.mxu1 }
  0xdc   :  { %412 = vst.msk [vmem:[%s787_s3 + $0xc] sm:$0xf] %vm408_vm1, %v464_v9  ;;  %v463_v15 = vpack.c.bf16 %v330_v11, %v330_v11  ;;  %v471_v16 = vpack.c.bf16 %v338_v12, %v338_v12  ;;  %v333_v17 = vmul.f32 %v525_v13, %v276_v45  ;;  %v341_v18 = vmul.f32 %v537_v14, %v316_v1 }
  0xdd   :  { %420 = vst.msk [vmem:[%s787_s3 + $0x2c] sm:$0xf] %vm408_vm1, %v472_v10  ;;  %v173_v19 = vpop.f32.mrf.mxu0  ;;  %v213_v20 = vpop.f32.mrf.mxu1 }
  0xde   :  { %411 = vst.msk [vmem:[%s787_s3 + $0x8] sm:$0xf] %vm408_vm1, %v463_v15  ;;  %419 = vst.msk [vmem:[%s787_s3 + $0x28] sm:$0xf] %vm408_vm1, %v471_v16  ;;  %v466_v22 = vpack.c.bf16 %v333_v17, %v333_v17  ;;  %v474_v23 = vpack.c.bf16 %v341_v18, %v341_v18  ;;  %v332_v24 = vmul.f32 %v271_v46, %v173_v19 }
  0xdf   :  { %v340_v25 = vmul.f32 %v311_v8, %v213_v20  ;;  %v528_v26 = vpop.f32.mrf.mxu0  ;;  %v540_v27 = vpop.f32.mrf.mxu1 }
  0xe0   :  { %414 = vst.msk [vmem:[%s787_s3 + $0x14] sm:$0xf] %vm408_vm1, %v466_v22  ;;  %422 = vst.msk [vmem:[%s787_s3 + $0x34] sm:$0xf] %vm408_vm1, %v474_v23  ;;  %v465_v29 = vpack.c.bf16 %v332_v24, %v332_v24  ;;  %v335_v31 = vmul.f32 %v528_v26, %v286_v47  ;;  %v343_v32 = vmul.f32 %v540_v27, %v326_v21 }
  0xe1   :  { %v473_v30 = vpack.c.bf16 %v340_v25, %v340_v25  ;;  %v183_v33 = vpop.f32.mrf.mxu0  ;;  %v223_v34 = vpop.f32.mrf.mxu1 }
  0xe2   :  { %413 = vst.msk [vmem:[%s787_s3 + $0x10] sm:$0xf] %vm408_vm1, %v465_v29  ;;  %v468_v35 = vpack.c.bf16 %v335_v31, %v335_v31  ;;  %v476_v36 = vpack.c.bf16 %v343_v32, %v343_v32  ;;  %v334_v37 = vmul.f32 %v717_v48, %v183_v33  ;;  %v342_v38 = vmul.f32 %v321_v28, %v223_v34 }
  0xe3   :  { %421 = vst.msk [vmem:[%s787_s3 + $0x30] sm:$0xf] %vm408_vm1, %v473_v30 }
  0xe4   :  { %416 = vst.msk [vmem:[%s787_s3 + $0x1c] sm:$0xf] %vm408_vm1, %v468_v35  ;;  %424 = vst.msk [vmem:[%s787_s3 + $0x3c] sm:$0xf] %vm408_vm1, %v476_v36  ;;  %v467_v39 = vpack.c.bf16 %v334_v37, %v334_v37  ;;  %v475_v40 = vpack.c.bf16 %v342_v38, %v342_v38 }
  0xe6   :  { %415 = vst.msk [vmem:[%s787_s3 + $0x18] sm:$0xf] %vm408_vm1, %v467_v39  ;;  %423 = vst.msk [vmem:[%s787_s3 + $0x38] sm:$0xf] %vm408_vm1, %v475_v40 }

</bundles_post_ra>
